<compile_context>
chip_gen: v6e
topology: v6e:2x2x1
jax: 0.10.0
libtpu: 0.0.40
codegen_flags: <defaults>
</compile_context>

<pallas_src>
import numpy as np
import jax
import jax.numpy as jnp
from jax import lax
from jax.experimental import pallas as pl
from jax.experimental.pallas import tpu as pltpu


def resblock_kernel(cols_ref, x_ref, w1_ref, b1_ref, w2_ref, b2_ref, o_ref):
    # cols_ref: (1, 9*Cin, HW)  im2col slab (taps*channels on sublanes, spatial on lanes)
    # x_ref:    (1, Cin, HW)    residual input, lane-dense
    # w1_ref:   (Ch, 9*Cin)     fused 3x3 conv weights
    # b1_ref:   (Ch, 1)
    # w2_ref:   (Cin, Ch)       1x1 conv weights
    # b2_ref:   (Cin, 1)
    # o_ref:    (1, Cin, HW)
    cols = cols_ref[0]                                   # (9*Cin, HW)

    # conv3x3: all 9 taps fused into a single K = 9*Cin contraction.
    hidden = jnp.dot(w1_ref[...], cols,
                     preferred_element_type=jnp.float32)  # (Ch, HW)
    hidden = jnp.maximum(hidden + b1_ref[...], 0.0)        # bias + ReLU

    # conv1x1 + bias + residual add + final ReLU, all lane-dense.
    out = jnp.dot(w2_ref[...], hidden,
                  preferred_element_type=jnp.float32)      # (Cin, HW)
    out = jnp.maximum(out + b2_ref[...] + x_ref[0], 0.0)

    o_ref[0] = out


def resblock_pallas(x_nchw, w1_torch, b1, w2_torch, b2):
    """x_nchw: (N, Cin, H, W) f32.  Weights in torch layout:
       w1_torch: (Ch, Cin, 3, 3), b1: (Ch,), w2_torch: (Cin, Ch, 1, 1), b2: (Cin,)."""
    N, Cin, H, W = x_nchw.shape
    Ch = w1_torch.shape[0]
    HW = H * W

    # --- wrapper-side glue (plain XLA): im2col + weight packing -------------
    x_flat = x_nchw.reshape(N, Cin, HW)                                 # residual, lane-dense
    x_pad = jnp.pad(x_nchw, ((0, 0), (0, 0), (1, 1), (1, 1)))           # (N,Cin,H+2,W+2)
    cols = jnp.stack(
        [x_pad[:, :, dh:dh + H, dw:dw + W] for dh in range(3) for dw in range(3)],
        axis=1)                                                          # (N, 9, Cin, H, W)
    cols = cols.reshape(N, 9 * Cin, HW)                                  # [n, k*Cin+i, h*W+w]

    # w1p[o, k*Cin + i] = w1_torch[o, i, dh, dw], k = dh*3 + dw  (cross-correlation)
    w1p = jnp.transpose(w1_torch, (0, 2, 3, 1)).reshape(Ch, 9 * Cin)
    w2m = w2_torch[:, :, 0, 0]                                           # (Cin, Ch)
    b1r = b1.reshape(Ch, 1)
    b2r = b2.reshape(Cin, 1)

    out_flat = pl.pallas_call(
        resblock_kernel,
        out_shape=jax.ShapeDtypeStruct((N, Cin, HW), jnp.float32),
        grid_spec=pltpu.PrefetchScalarGridSpec(
            num_scalar_prefetch=0,
            grid=(N,),
            in_specs=[
                pl.BlockSpec((1, 9 * Cin, HW), lambda n: (n, 0, 0)),
                pl.BlockSpec((1, Cin, HW), lambda n: (n, 0, 0)),
                pl.BlockSpec((Ch, 9 * Cin), lambda n: (0, 0)),
                pl.BlockSpec((Ch, 1), lambda n: (0, 0)),
                pl.BlockSpec((Cin, Ch), lambda n: (0, 0)),
                pl.BlockSpec((Cin, 1), lambda n: (0, 0)),
            ],
            out_specs=pl.BlockSpec((1, Cin, HW), lambda n: (n, 0, 0)),
        ),
        compiler_params=pltpu.CompilerParams(dimension_semantics=("parallel",)),
    )(cols, x_flat, w1p, b1r, w2m, b2r)

    return out_flat.reshape(N, Cin, H, W)                                # NCHW, no transpose


def resblock_reference(x_nchw, w1_torch, b1, w2_torch, b2):
    """Pure-JAX reference of the PyTorch forward (NCHW, cross-correlation)."""
    dn = lax.conv_dimension_numbers(x_nchw.shape, w1_torch.shape, ("NCHW", "OIHW", "NCHW"))
    h = lax.conv_general_dilated(x_nchw, w1_torch, (1, 1), ((1, 1), (1, 1)),
                                 dimension_numbers=dn)
    h = h + b1.reshape(1, -1, 1, 1)
    h = jnp.maximum(h, 0.0)
    dn2 = lax.conv_dimension_numbers(h.shape, w2_torch.shape, ("NCHW", "OIHW", "NCHW"))
    o = lax.conv_general_dilated(h, w2_torch, (1, 1), ((0, 0), (0, 0)),
                                 dimension_numbers=dn2)
    o = o + b2.reshape(1, -1, 1, 1)
    return jnp.maximum(o + x_nchw, 0.0)


if __name__ == "__main__":
    # Small shapes consistent with ResBlock(input_channels=4, channel=8).
    N, Cin, Ch, H, W = 2, 4, 8, 16, 16

    key = jax.random.PRNGKey(0)
    kx, k1, k2, k3, k4 = jax.random.split(key, 5)
    x = jax.random.normal(kx, (N, Cin, H, W), jnp.float32)
    w1 = 0.1 * jax.random.normal(k1, (Ch, Cin, 3, 3), jnp.float32)   # Conv2d(Cin,Ch,3,pad=1)
    b1 = 0.1 * jax.random.normal(k2, (Ch,), jnp.float32)
    w2 = 0.1 * jax.random.normal(k3, (Cin, Ch, 1, 1), jnp.float32)   # Conv2d(Ch,Cin,1)
    b2 = 0.1 * jax.random.normal(k4, (Cin,), jnp.float32)

    out = resblock_pallas(x, w1, b1, w2, b2)
    out = jax.block_until_ready(out)

    ref = jax.block_until_ready(resblock_reference(x, w1, b1, w2, b2))
    np.testing.assert_allclose(np.asarray(out), np.asarray(ref), rtol=1e-4, atol=1e-4)

    print("KERNEL_OK")
</pallas_src>

<mosaic_0001>
module attributes {stable_mosaic.version = 11 : i64} {
  func.func @resblock_kernel(%arg0: i32, %arg1: memref<1x36x256xf32, #tpu.memory_space<vmem>>, %arg2: memref<1x4x256xf32, #tpu.memory_space<vmem>>, %arg3: memref<8x36xf32, #tpu.memory_space<vmem>>, %arg4: memref<8x1xf32, #tpu.memory_space<vmem>>, %arg5: memref<4x8xf32, #tpu.memory_space<vmem>>, %arg6: memref<4x1xf32, #tpu.memory_space<vmem>>, %arg7: memref<1x4x256xf32, #tpu.memory_space<vmem>>) attributes {dimension_semantics = [#tpu.dimension_semantics<parallel>], iteration_bounds = array<i64: 2>, scalar_prefetch = 0 : i64, scratch_operands = 0 : i64, tpu.core_type = #tpu.core_type<tc>, window_params = [{transform_indices = @transform_0, window_bounds = array<i64: 1, 36, 256>}, {transform_indices = @transform_1, window_bounds = array<i64: 1, 4, 256>}, {pipeline_mode = #tpu.pipeline_mode<synchronous>, transform_indices = @transform_2, window_bounds = array<i64: 8, 36>}, {pipeline_mode = #tpu.pipeline_mode<synchronous>, transform_indices = @transform_3, window_bounds = array<i64: 8, 1>}, {pipeline_mode = #tpu.pipeline_mode<synchronous>, transform_indices = @transform_4, window_bounds = array<i64: 4, 8>}, {pipeline_mode = #tpu.pipeline_mode<synchronous>, transform_indices = @transform_5, window_bounds = array<i64: 4, 1>}, {transform_indices = @transform_6, window_bounds = array<i64: 1, 4, 256>}]} {
    %c0 = arith.constant 0 : index
    %c0_0 = arith.constant 0 : index
    %c0_1 = arith.constant 0 : index
    %0 = vector.load %arg1[%c0, %c0_0, %c0_1] : memref<1x36x256xf32, #tpu.memory_space<vmem>>, vector<1x36x256xf32>
    %1 = vector.shape_cast %0 : vector<1x36x256xf32> to vector<36x256xf32>
    %c0_2 = arith.constant 0 : index
    %c0_3 = arith.constant 0 : index
    %2 = vector.load %arg3[%c0_2, %c0_3] : memref<8x36xf32, #tpu.memory_space<vmem>>, vector<8x36xf32>
    %cst = arith.constant dense<0.000000e+00> : vector<8x256xf32>
    %3 = tpu.matmul %2, %1, %cst {dimension_numbers = #tpu.dot_dimension_numbers<[1], [0], [0], [1], [0, 0, 1, 1], [], []>} : vector<8x36xf32>, vector<36x256xf32>, vector<8x256xf32> -> vector<8x256xf32>
    %c0_4 = arith.constant 0 : index
    %c0_5 = arith.constant 0 : index
    %4 = vector.load %arg4[%c0_4, %c0_5] : memref<8x1xf32, #tpu.memory_space<vmem>>, vector<8x1xf32>
    %5 = vector.broadcast %4 : vector<8x1xf32> to vector<8x256xf32>
    %6 = arith.addf %3, %5 : vector<8x256xf32>
    %cst_6 = arith.constant 0.000000e+00 : f32
    %7 = vector.broadcast %cst_6 : f32 to vector<8x256xf32>
    %8 = arith.maximumf %6, %7 : vector<8x256xf32>
    %c0_7 = arith.constant 0 : index
    %c0_8 = arith.constant 0 : index
    %9 = vector.load %arg5[%c0_7, %c0_8] : memref<4x8xf32, #tpu.memory_space<vmem>>, vector<4x8xf32>
    %cst_9 = arith.constant dense<0.000000e+00> : vector<4x256xf32>
    %10 = tpu.matmul %9, %8, %cst_9 {dimension_numbers = #tpu.dot_dimension_numbers<[1], [0], [0], [1], [0, 0, 1, 1], [], []>} : vector<4x8xf32>, vector<8x256xf32>, vector<4x256xf32> -> vector<4x256xf32>
    %c0_10 = arith.constant 0 : index
    %c0_11 = arith.constant 0 : index
    %11 = vector.load %arg6[%c0_10, %c0_11] : memref<4x1xf32, #tpu.memory_space<vmem>>, vector<4x1xf32>
    %12 = vector.broadcast %11 : vector<4x1xf32> to vector<4x256xf32>
    %13 = arith.addf %10, %12 : vector<4x256xf32>
    %c0_12 = arith.constant 0 : index
    %c0_13 = arith.constant 0 : index
    %c0_14 = arith.constant 0 : index
    %14 = vector.load %arg2[%c0_12, %c0_13, %c0_14] : memref<1x4x256xf32, #tpu.memory_space<vmem>>, vector<1x4x256xf32>
    %15 = vector.shape_cast %14 : vector<1x4x256xf32> to vector<4x256xf32>
    %16 = arith.addf %13, %15 : vector<4x256xf32>
    %cst_15 = arith.constant 0.000000e+00 : f32
    %17 = vector.broadcast %cst_15 : f32 to vector<4x256xf32>
    %18 = arith.maximumf %16, %17 : vector<4x256xf32>
    %c0_16 = arith.constant 0 : index
    %c0_17 = arith.constant 0 : index
    %c0_18 = arith.constant 0 : index
    %19 = vector.load %arg7[%c0_16, %c0_17, %c0_18] : memref<1x4x256xf32, #tpu.memory_space<vmem>>, vector<1x4x256xf32>
    %20 = vector.shape_cast %19 : vector<1x4x256xf32> to vector<4x256xf32>
    %21 = vector.shape_cast %18 : vector<4x256xf32> to vector<1x4x256xf32>
    tpu.vector_store %arg7[%c0_16, %c0_17, %c0_18], %21 {strides = array<i32>} : memref<1x4x256xf32, #tpu.memory_space<vmem>>, vector<1x4x256xf32>,
    return
  }
  func.func @transform_0(%arg0: i32) -> (i32, i32, i32) {
    %c0_i32 = arith.constant 0 : i32
    %c0_i32_0 = arith.constant 0 : i32
    %c0_i32_1 = arith.constant 0 : i32
    return %arg0, %c0_i32, %c0_i32_0 : i32, i32, i32
  }
  func.func @transform_1(%arg0: i32) -> (i32, i32, i32) {
    %c0_i32 = arith.constant 0 : i32
    %c0_i32_0 = arith.constant 0 : i32
    %c0_i32_1 = arith.constant 0 : i32
    return %arg0, %c0_i32, %c0_i32_0 : i32, i32, i32
  }
  func.func @transform_2(%arg0: i32) -> (i32, i32) {
    %c0_i32 = arith.constant 0 : i32
    %c0_i32_0 = arith.constant 0 : i32
    %c0_i32_1 = arith.constant 0 : i32
    return %c0_i32, %c0_i32_0 : i32, i32
  }
  func.func @transform_3(%arg0: i32) -> (i32, i32) {
    %c0_i32 = arith.constant 0 : i32
    %c0_i32_0 = arith.constant 0 : i32
    %c0_i32_1 = arith.constant 0 : i32
    return %c0_i32, %c0_i32_0 : i32, i32
  }
  func.func @transform_4(%arg0: i32) -> (i32, i32) {
    %c0_i32 = arith.constant 0 : i32
    %c0_i32_0 = arith.constant 0 : i32
    %c0_i32_1 = arith.constant 0 : i32
    return %c0_i32, %c0_i32_0 : i32, i32
  }
  func.func @transform_5(%arg0: i32) -> (i32, i32) {
    %c0_i32 = arith.constant 0 : i32
    %c0_i32_0 = arith.constant 0 : i32
    %c0_i32_1 = arith.constant 0 : i32
    return %c0_i32, %c0_i32_0 : i32, i32
  }
  func.func @transform_6(%arg0: i32) -> (i32, i32, i32) {
    %c0_i32 = arith.constant 0 : i32
    %c0_i32_0 = arith.constant 0 : i32
    %c0_i32_1 = arith.constant 0 : i32
    return %arg0, %c0_i32, %c0_i32_0 : i32, i32, i32
  }
}

</mosaic_0001>

<bundles_post_ra>
// kernel: tpu_custom_call.1
= control target key start
LH: loop header
LB: loop body
LE: loop exit
PB: predicated region body
PF: predicated region fallthrough
CT: control target
= control target key end

     0   :  { %11 = vsyncpa [#allocation3], 0  ;;  %s821_s0 = inlined_call_operand.vmem [shape: f32[2,36,256], index: 0, kind: input, shape index: {}]   ;;  %s822_s1 = inlined_call_operand.vmem [shape: f32[2,4,256], index: 1, kind: input, shape index: {}]   ;;  %s823_s2 = inlined_call_operand.vmem [shape: f32[8,36], index: 2, kind: input, shape index: {}]   ;;  %s824_s3 = inlined_call_operand.vmem [shape: f32[8,1], index: 3, kind: input, shape index: {}]   ;;  %s825_s4 = inlined_call_operand.vmem [shape: f32[4,8], index: 4, kind: input, shape index: {}]   ;;  %s826_s5 = inlined_call_operand.vmem [shape: f32[4,1], index: 5, kind: input, shape index: {}]   ;;  %s827_s6 = inlined_call_operand.hbm [shape: f32[2,4,256], index: 6, kind: output, shape index: {}]  }
   0x1   :  { %13 = vsyncpa [#allocation3 + $0x1], 0  ;;  %s715_s21 = smov 0   ;;  %s717_s22 = smov 0  }
   0x2   :  { %s719_s23 = smov 0   ;;  %s721_s24 = smov 0  }
   0x3 LB: > { %s736_s25 = sadd.s32 4294967295, %s675_s24   ;;  %s552_s26 = sadd.s32 4294967294, %s675_s24   ;;  %s675_s24 = sphi %s721_s24, %s833_s24   ;;  %s671_s23 = sphi %s719_s23, %s832_s23   ;;  %s667_s22 = sphi %s717_s22, %s831_s22   ;;  %s663_s21 = sphi %s715_s21, %s830_s21  }
   0x4   : > { %s740_s27 = sadd.s32 1, %s675_s24   ;;  %s162_s28 = sadd.s32 1, %s671_s23 }
   0x5   : > { %s159_s29 = ssub.s32 %s675_s24, %s740_s27  ;;  %p172_p0 = scmp.ne.s32.totalorder %s671_s23, %s667_s22 }
   0x6   : > { %p160_p1 = scmp.eq.s32.totalorder %s159_s29, 0  ;;  %p173_p2 = scmp.eq.s32.totalorder %s736_s25, 1 }
   0x7   : > { %p178_p3 = scmp.ne.s32.totalorder %s667_s22, %s663_s21  ;;  %p179_p4 = scmp.eq.s32.totalorder %s552_s26, 1 }
   0x8   : > { %s751_s30 = scalar_select %p160_p1, %s671_s23, %s162_s28  }
   0x9   : > { %p753_p5 = por %p173_p2, %p172_p0  ;;  %p757_p6 = por %p179_p4, %p178_p3 }
   0xa   : > { %p555_p7 = scmp.ge.s32.totalorder %s675_s24, 1  ;;  %p225_p8 = scmp.lt.s32.totalorder %s675_s24, 3 }
   0xc   : > { %p226_p9 = pnand %p555_p7, %p225_p8 }
   0xd   : > { %p260_p10 = scmp.lt.s32.totalorder (!%p226_p9), %s736_s25, 1  ;;  %s257_s12 = sand.u32 (!%p226_p9), 1, %s667_s22  }
   0xe   : > { %229 = sbr.rel (%p226_p9) target bundleno = 452 (0x1c4), region = 44  ;;  %s556_s13 = sshll.u32 (!%p226_p9), %s257_s12, 3 }
   0xf   : > { %s259_s15 = scalar_lea.vmem (!%p226_p9), [#allocation2], %s556_s13  ;;  %s467_s19 = scalar_lea.sflag (!%p226_p9), [#allocation3], %s257_s12 }
  0x10   : > { %s481_s16 = sshll.u32 (!%p226_p9), %s259_s15, 4  ;;  %s679_s26 = smov (!%p226_p9), [#allocation2]   ;;  %s482_s16 = int_to_ptr.vmem [resolvable:$true] %s481_s16 }
  0x11   : > { %s615_s20 = scalar_lea.vmem (!%p226_p9), %s482_s16, 128 }
  0x12   : > { %p616_p11 = scmp.ne.s32.totalorder (!%p226_p9), %s482_s16, %s615_s20 }
  0x13   : > { %v677_v0 = vmov 0.0   ;;  %v678_v1 = vmov 0   ;;  %v281_v2 = vld [vmem:[%s824_s3] sm:$0xff]  ;;  %s768_s11 = scalar_select %p260_p10, %s736_s25, 1  ;;  %vm291_vm0 = vcmask 1043456   ;;  %vm287_vm1 = vcmask 293888  }
  0x14   : > { %362 = vmatprep.mubr.f32.mxu0 %v677_v0  ;;  %613 = vset.pattern.permute.xlu0 %v678_v1  ;;  %v372_v3 = vld [vmem:[%s826_s5] sm:$0xf]  ;;  %vm378_vm2 = vcmask 64512   ;;  %p617_p12 = pnand %p616_p11, %p753_p5 }
  0x15   : > { %284 = vperm.xlu0 %613, %v281_v2   ;;  %446 = vmatprep.mubr.f32.mxu1 %v677_v0  ;;  %s571_s14 = smul.u32 80, %s768_s11  ;;  %v280_v14 = vld [vmem:[%s823_s2] sm:$0xff]  ;;  %s569_s28 = sshll.u32 %s768_s11, 3 }
  0x16   : > { %v371_v22 = vld [vmem:[%s825_s4] sm:$0xf]  ;;  %s269_s10 = scalar_lea.vmem %s822_s1, %s569_s28  ;;  %p618_p13 = pneg %p617_p12 }
  0x17   : > { %s264_s17 = scalar_lea.vmem %s821_s0, %s571_s14  ;;  %v453_v23 = vld [vmem:[%s269_s10] sm:$0xff]  ;;  %s570_s14 = sshll.u32 %s736_s25, 7 }
  0x18   : > { %v279_v4 = vld [vmem:[%s264_s17 + $0x48] sm:$0xf]  ;;  %v278_v5 = vld [vmem:[%s264_s17 + $0x40] sm:$0xf]  ;;  %v277_v6 = vld [vmem:[%s264_s17 + $0x38] sm:$0xff]  ;;  %v455_v27 = vcombine.high %v453_v23, %v453_v23  ;;  %s479_s18 = scalar_lea.hbm %s827_s6, %s570_s14  ;;  %s619_s28 = sshll.u32 %s679_s26, 4  ;;  %s620_s28 = int_to_ptr.vmem [resolvable:$false] %s619_s28 }
  0x19   : > { %375 = vperm.xlu0 %613, %v372_v3   ;;  %560 = vmatprep.subr.msk.mxu0 %vm291_vm0, %v279_v4  ;;  %v276_v7 = vld [vmem:[%s264_s17 + $0x30] sm:$0xff]  ;;  %v275_v8 = vld [vmem:[%s264_s17 + $0x28] sm:$0xff]  ;;  %v274_v9 = vld [vmem:[%s264_s17 + $0x20] sm:$0xff]  ;;  %s621_s25 = scalar_lea.vmem %s620_s28, 256  ;;  %p622_p0 = scmp.lt.s32.totalorder %s482_s16, %s620_s28 }
  0x1a   : > { %561 = vmatpush1.msk.msra.mxu0 %vm291_vm0, %v278_v5  ;;  %v273_v10 = vld [vmem:[%s264_s17 + $0x18] sm:$0xff]  ;;  %v272_v11 = vld [vmem:[%s264_s17 + $0x10] sm:$0xff]  ;;  %v271_v12 = vld [vmem:[%s264_s17 + $0x8] sm:$0xff]  ;;  %p623_p1 = scmp.lt.s32.totalorder %s621_s25, %s615_s20 }
  0x1b   : > { %322 = vmatprep.subr.mxu0 %v277_v6  ;;  %v270_v13 = vld [vmem:[%s264_s17] sm:$0xff] }
  0x1c   : > { %323 = vmatpush1.msra.mxu0 %v276_v7  ;;  %p624_p2 = por %p623_p1, %p622_p0 }
  0x1d   : > { %324 = vmatprep.subr.mxu0 %v275_v8 }
  0x1e   : > { %325 = vmatpush1.msra.mxu0 %v274_v9  ;;  %p625_p3 = pnand %p624_p2, %p618_p13 }
  0x1f   : > { %326 = vmatprep.subr.mxu0 %v273_v10 }
  0x20   : > { %327 = vmatpush1.msra.mxu0 %v272_v11 }
  0x21   : > { %328 = vmatprep.subr.mxu0 %v271_v12 }
  0x22   : > { %329 = vmatpush1.msra.mxu0 %v270_v13 }
  0x23   : > { %562 = vmatmul.mubr.msk.f32.vlgmr.msra.gmra.mxu0 %vm287_vm1, %v280_v14 }
  0x90   : > { %v285_v16 = vpop.permute.xlu0 %284 }
  0x94   : > { %v376_v24 = vpop.permute.xlu0 %375 }
  0xe3   : > { %v364_v15 = vpop.f32.mrf.mxu0 }
  0xe4   : > { %v365_v17 = vadd.f32 %v364_v15, %v285_v16 }
  0xe5   : > { %v366_v18 = vpop.f32.mrf.mxu0 }
  0xe6   : > { %v367_v19 = vadd.f32 %v366_v18, %v285_v16  ;;  %v369_v21 = vmax.f32 %v365_v17, 0.0 }
  0xe8   : > { %v370_v20 = vmax.f32 %v367_v19, 0.0 }
  0xea   : > { %412 = vmatprep.subr.mxu1 %v370_v20 }
  0xeb   : > { %413 = vmatpush1.msra.mxu1 %v369_v21 }
  0xec   : > { %563 = vmatmul.mubr.msk.f32.vlgmr.msra.gmra.mxu1 %vm378_vm2, %v371_v22 }
 0x1ac   : > { %v448_v25 = vpop.f32.mrf.mxu1 }
 0x1ad   : > { %v449_v26 = vadd.f32 %v448_v25, %v376_v24 }
 0x1ae   : > { %v450_v28 = vpop.f32.mrf.mxu1 }
 0x1af   : > { %v457_v29 = vadd.f32 %v453_v23, %v449_v26  ;;  %v451_v30 = vadd.f32 %v450_v28, %v376_v24 }
 0x1b1   : > { %v458_v31 = vadd.f32 %v455_v27, %v451_v30  ;;  %v459_v32 = vmax.f32 %v457_v29, 0.0 }
 0x1b3   : > { %v460_v33 = vmax.f32 %v458_v31, 0.0 }
 0x1b5   : > { %v463_v34 = vcombine.low %v459_v32, %v460_v33 }
 0x1b7   : > { %465 = vst [vmem:[%s259_s15] sm:$0xff] %v463_v34 }
 0x1b8   : > { %628 = shalt.err (!%p625_p3)
}
 0x1b9   : > { %s629_s29 = scalar_lea.hbm %s479_s18, 128  ;;  %s633_s12 = scalar_lea.hbm %s827_s6, 256 }
 0x1ba   : > { %p630_p4 = scmp.ne.s32.totalorder %s479_s18, %s629_s29  ;;  %p634_p9 = scmp.lt.s32.totalorder %s479_s18, %s827_s6 }
 0x1bb   : > { %p635_p10 = scmp.lt.s32.totalorder %s633_s12, %s629_s29 }
 0x1bc   : > { %p631_p7 = pnand %p630_p4, %p753_p5 }
 0x1bd   : > { %p636_p11 = por %p635_p10, %p634_p9 }
 0x1be   : > { %p632_p8 = pneg %p631_p7 }
 0x1c0   : > { %p637_p12 = pnand %p636_p11, %p632_p8 }
 0x1c2   : > { %640 = shalt.err (!%p637_p12)
}
 0x1c3   : > { %572 = dma.vmem_to_hbm [thread:$0]  (%p753_p5), %s482_s16, 128, %s479_s18, %s467_s19  }
 0x1c4 PF: > { %p578_p13 = scmp.ge.s32.totalorder %s675_s24, 2  ;;  %s493_s15 = sand.u32 1, %s663_s21  }
 0x1c5   : > { %s494_s11 = scalar_lea.sflag [#allocation3], %s493_s15 }
 0x1c6   : > { %p575_p0 = pnand %p578_p13, %p757_p6 }
 0x1c8   : > { %p576_p1 = pneg %p575_p0 }
 0x1ca   : > { %658 = dma.done.wait (%p576_p1), %s494_s11, 128  }
 0x1cb   : > { %660 = vsyncadd (%p576_p1), %s494_s11, 4294967168  ;;  %p16_p2 = scmp.ge.s32.totalorder %s740_s27, 4   ;;  %s830_s21 = smov %s667_s22 }
 0x1cc   : > { %s831_s22 = smov %s671_s23  ;;  %s832_s23 = smov %s751_s30 }
 0x1cd   : > { %s833_s24 = smov %s740_s27  ;;  %18 = sbr.rel (!%p16_p2) target bundleno = 3 (0x3), region = 82 }
 0x1d2   :  { %499 = vsyncpa [#allocation3], 1 }
 0x1d3   :  { %501 = vsyncpa [#allocation3 + $0x1], 1 }

</bundles_post_ra>
